<compile_context>
chip_gen: v5e
topology: v5e:2x2
jax: 0.10.0
libtpu: 0.0.40
codegen_flags: <defaults>
</compile_context>

<pallas_src>
import functools
from typing import NamedTuple

import jax
import jax.numpy as jnp
from jax.experimental import pallas as pl
from jax.experimental.pallas import tpu as pltpu


# ----------------------------------------------------------------------------
# Kernel
# ----------------------------------------------------------------------------
def _speakernet_kernel(x_ref, w1_ref, b1_ref, w2_ref, b2_ref, out_ref, acc_ref):
    # x:   (TM, TK)  native dtype (cast to bf16 here, not in HBM)
    # w1:  (TK, n_mels) bf16      b1: (1, n_mels) f32
    # w2:  (n_mels, nOut) bf16    b2: (1, nOut)  f32
    # acc: (TM, n_mels) f32       out: (TM, nOut) bf16
    k = pl.program_id(1)

    @pl.when(k == 0)
    def _():
        acc_ref[...] = jnp.zeros_like(acc_ref)

    acc_ref[...] += jnp.dot(x_ref[...].astype(jnp.bfloat16), w1_ref[...],
                            preferred_element_type=jnp.float32)

    @pl.when(k == pl.num_programs(1) - 1)
    def _():
        # Elementwise epilogue stays f32 (no bf16 VPU on v5e); the only bf16
        # cast is right before the second MXU dot.
        h = jnp.maximum(acc_ref[...] + b1_ref[...], 0.0)
        o = jnp.dot(h.astype(jnp.bfloat16), w2_ref[...],
                    preferred_element_type=jnp.float32) + b2_ref[...]
        out_ref[...] = o.astype(out_ref.dtype)


# ----------------------------------------------------------------------------
# Static configuration (computed once, cached with the prepared weights)
# ----------------------------------------------------------------------------
class _Cfg(NamedTuple):
    L: int          # raw waveform length expected by w1
    l_pad: int      # padded K (== L unless the rare pad fallback is needed)
    tk: int         # K tile (divides l_pad)
    tm_target: int  # row tile target
    vmem_limit: int # vmem_limit_bytes for CompilerParams


def _round_up(x, m):
    return ((x + m - 1) // m) * m


def _vmem_capacity_bytes():
    """Generation-dependent VMEM capacity; conservative default on failure."""
    try:
        return int(pltpu.get_tpu_info().vmem_capacity_bytes)
    except Exception:
        return 64 * 1024 * 1024   # assume v7x-like (smallest) if query fails


def _choose_tk(L, target):
    """Pick a K tile with zero padding whenever possible."""
    if L <= target:
        return L, L                       # single full-dim block (no 128 rule)
    if L % 128 == 0:
        t = (target // 128) * 128
        for cand in range(t, 127, -128):  # largest 128-multiple divisor <= target
            if L % cand == 0:
                return cand, L
    # Rare fallback: L > target and not a multiple of 128 -> pad K (copy of x
    # happens in forward; w1 pad is cached once in prepare_params).
    l_pad = _round_up(L, 128)
    t = (target // 128) * 128
    for cand in range(t, 127, -128):
        if l_pad % cand == 0:
            return cand, l_pad
    return 128, l_pad


def prepare_params(params):
    """One-time weight preprocessing (bf16 casts, reshapes, optional K pad)."""
    w1, b1, w2, b2 = params
    L, n_mels = w1.shape
    n_out = w2.shape[1]

    vmem = _vmem_capacity_bytes()
    big_vmem = vmem >= 100 * 1024 * 1024        # v5e / v6e (128 MiB)
    tk_target = 4096 if big_vmem else 2048       # v7x: smaller tiles, 64 MiB/TC
    tm_target = 1024 if big_vmem else 512
    vmem_limit = (96 if big_vmem else 48) * 1024 * 1024

    tk, l_pad = _choose_tk(L, tk_target)

    w1b = w1.astype(jnp.bfloat16)
    if l_pad != L:   # rare fallback path only
        w1b = jnp.zeros((l_pad, n_mels), jnp.bfloat16).at[:L, :].set(w1b)

    weights = (
        w1b,
        b1.reshape(1, n_mels).astype(jnp.float32),
        w2.astype(jnp.bfloat16),
        b2.reshape(1, n_out).astype(jnp.float32),
    )
    cfg = _Cfg(L=L, l_pad=l_pad, tk=tk, tm_target=tm_target,
               vmem_limit=vmem_limit)
    return weights, cfg


# ----------------------------------------------------------------------------
# Forward
# ----------------------------------------------------------------------------
@functools.partial(jax.jit, static_argnames=("cfg", "out_dtype"))
def speakernet_forward(data, weights, cfg: _Cfg, out_dtype=jnp.bfloat16):
    """Mirrors SpeakerNet.forward(data, label=None) on the embedding path.

    data: arbitrary leading dims, last dim = raw sample length L
          (matches `data = data.reshape(-1, data.size()[-1])`).
    Returns embeddings of shape (N, nOut), N = prod(leading dims).
    """
    w1b, b1f, w2b, b2f = weights
    x = data.reshape(-1, data.shape[-1])
    N, L = x.shape
    assert L == cfg.L, "waveform length does not match prepared weights"
    n_mels = w1b.shape[1]
    n_out = w2b.shape[1]

    # Row tiling: single full-dim tile for typical small-N inference (no 8-
    # divisibility needed when the block equals the full dim); otherwise
    # balanced 8-multiple tiles with a cdiv grid (masked partial last block,
    # no row padding, no trailing slice).
    if N <= cfg.tm_target:
        tm = N
        n_row_tiles = 1
    else:
        n_row_tiles = -(-N // cfg.tm_target)
        tm = _round_up(-(-N // n_row_tiles), 8)
        n_row_tiles = -(-N // tm)

    # K tiling: tk divides l_pad by construction.  Padding of x only on the
    # rare fallback path (L > target and L % 128 != 0).
    if cfg.l_pad != L:
        x = jnp.zeros((N, cfg.l_pad), x.dtype).at[:, :L].set(x)
    tk = cfg.tk
    n_k = cfg.l_pad // tk

    grid = (n_row_tiles, n_k)

    # w1 is the sole streamed operand when there is a single row tile: buffer
    # it 3 deep to keep HBM saturated across grid-step boundaries.
    w1_spec = pl.BlockSpec((tk, n_mels), lambda i, k: (k, 0))
    if n_row_tiles == 1 and n_k >= 3:
        try:
            w1_spec = pl.BlockSpec((tk, n_mels), lambda i, k: (k, 0),
                                   pipeline_mode=pl.Buffered(3))
        except TypeError:
            pass  # older API without pipeline_mode: default double-buffering

    x_bytes = x.dtype.itemsize
    out_bytes = jnp.dtype(out_dtype).itemsize
    flops = 2 * N * (cfg.l_pad * n_mels + n_mels * n_out)
    bytes_accessed = (
        N * cfg.l_pad * x_bytes                    # x streamed once
        + n_row_tiles * w1b.size * 2               # w1 re-read per row tile
        + w2b.size * 2 + b1f.size * 4 + b2f.size * 4
        + N * n_out * out_bytes)                   # output writeback

    out = pl.pallas_call(
        _speakernet_kernel,
        out_shape=jax.ShapeDtypeStruct((N, n_out), out_dtype),
        grid_spec=pltpu.PrefetchScalarGridSpec(
            num_scalar_prefetch=0,
            grid=grid,
            in_specs=[
                pl.BlockSpec((tm, tk), lambda i, k: (i, k)),         # x tile
                w1_spec,                                             # w1 slab
                pl.BlockSpec((1, n_mels), lambda i, k: (0, 0)),      # b1
                pl.BlockSpec((n_mels, n_out), lambda i, k: (0, 0)),  # w2
                pl.BlockSpec((1, n_out), lambda i, k: (0, 0)),       # b2
            ],
            out_specs=pl.BlockSpec((tm, n_out), lambda i, k: (i, 0)),
            scratch_shapes=[pltpu.VMEM((tm, n_mels), jnp.float32)],
        ),
        compiler_params=pltpu.CompilerParams(
            # rows are embarrassingly parallel (megacore); K is a reduction.
            dimension_semantics=("parallel", "arbitrary"),
            vmem_limit_bytes=cfg.vmem_limit,
        ),
        cost_estimate=pl.CostEstimate(
            flops=flops, transcendentals=0, bytes_accessed=bytes_accessed),
    )(x, w1b, b1f, w2b, b2f)

    # TODO(synk): for v7x with a single row tile, a 2-way split-K over the two
    # TensorCores (leading grid axis of size 2 + tiny combine) would recover
    # the idle core; not implemented here.
    return out


def init_params(key, L, n_mels, n_out):
    k1, k2, k3, k4 = jax.random.split(key, 4)
    w1 = jax.random.normal(k1, (L, n_mels), jnp.float32) * (1.0 / jnp.sqrt(L))
    b1 = jax.random.normal(k2, (n_mels,), jnp.float32) * 0.01
    w2 = jax.random.normal(k3, (n_mels, n_out), jnp.float32) * (1.0 / jnp.sqrt(n_mels))
    b2 = jax.random.normal(k4, (n_out,), jnp.float32) * 0.01
    return (w1, b1, w2, b2)


if __name__ == "__main__":
    # Small shapes: batch=2 utterances, nPerSpeaker=1, L=256 samples,
    # n_mels=64, nOut=128 (embedding dim).
    key = jax.random.PRNGKey(0)
    kd, kp = jax.random.split(key)

    batch, n_per_speaker, L = 2, 1, 256
    n_mels, n_out = 64, 128

    data = jax.random.normal(kd, (batch, n_per_speaker, L), jnp.float32)
    params = init_params(kp, L, n_mels, n_out)

    weights, cfg = prepare_params(params)          # one-time weight prep
    emb = speakernet_forward(data, weights, cfg)   # jitted forward
    emb = jax.block_until_ready(emb)

    # Pure-JAX f32 reference for the same synthetic encoder (kernel uses bf16
    # MXU inputs / bf16 output with f32 accumulation -> loosened tolerance).
    x = data.reshape(-1, L)
    w1, b1, w2, b2 = params
    ref = jnp.maximum(x @ w1 + b1, 0.0) @ w2 + b2
    assert emb.shape == (batch * n_per_speaker, n_out)
    err = jnp.max(jnp.abs(emb.astype(jnp.float32) - ref))
    assert jnp.allclose(emb.astype(jnp.float32), ref, atol=1e-1, rtol=1e-1), float(err)

    # TODO(synk): training path (LossFunction cross-entropy + prec1 accuracy,
    # LossFunction_with_transformer, ID_task head) not implemented — their
    # sources are not part of the provided module.
    print("KERNEL_OK")
</pallas_src>

<mosaic_0001>
module attributes {stable_mosaic.version = 11 : i64} {
  func.func @_speakernet_kernel(%arg0: i32, %arg1: i32, %arg2: memref<2x256xf32, #tpu.memory_space<vmem>>, %arg3: memref<256x64xbf16, #tpu.memory_space<vmem>>, %arg4: memref<1x64xf32, #tpu.memory_space<vmem>>, %arg5: memref<64x128xbf16, #tpu.memory_space<vmem>>, %arg6: memref<1x128xf32, #tpu.memory_space<vmem>>, %arg7: memref<2x128xbf16, #tpu.memory_space<vmem>>, %arg8: memref<2x64xf32, #tpu.memory_space<vmem>>) attributes {dimension_semantics = [#tpu.dimension_semantics<parallel>, #tpu.dimension_semantics<arbitrary>], iteration_bounds = array<i64: 1, 1>, scalar_prefetch = 0 : i64, scratch_operands = 1 : i64, tpu.core_type = #tpu.core_type<tc>, window_params = [{transform_indices = @transform_0, window_bounds = array<i64: 2, 256>}, {transform_indices = @transform_1, window_bounds = array<i64: 256, 64>}, {pipeline_mode = #tpu.pipeline_mode<synchronous>, transform_indices = @transform_2, window_bounds = array<i64: 1, 64>}, {pipeline_mode = #tpu.pipeline_mode<synchronous>, transform_indices = @transform_3, window_bounds = array<i64: 64, 128>}, {pipeline_mode = #tpu.pipeline_mode<synchronous>, transform_indices = @transform_4, window_bounds = array<i64: 1, 128>}, {transform_indices = @transform_5, window_bounds = array<i64: 2, 128>}]} {
    %c0_i32 = arith.constant 0 : i32
    %0 = arith.cmpi eq, %arg1, %c0_i32 : i32
    %1 = arith.extui %0 : i1 to i32
    %c0_i32_0 = arith.constant 0 : i32
    %2 = arith.cmpi ne, %1, %c0_i32_0 : i32
    scf.if %2 {
      %cst_10 = arith.constant 0.000000e+00 : f32
      %13 = vector.broadcast %cst_10 : f32 to vector<2x64xf32>
      %c0_11 = arith.constant 0 : index
      %c0_12 = arith.constant 0 : index
      %14 = vector.load %arg8[%c0_11, %c0_12] : memref<2x64xf32, #tpu.memory_space<vmem>>, vector<2x64xf32>
      tpu.vector_store %arg8[%c0_11, %c0_12], %13 {strides = array<i32>} : memref<2x64xf32, #tpu.memory_space<vmem>>, vector<2x64xf32>,
    } else {
    }
    %c0 = arith.constant 0 : index
    %c0_1 = arith.constant 0 : index
    %3 = vector.load %arg8[%c0, %c0_1] : memref<2x64xf32, #tpu.memory_space<vmem>>, vector<2x64xf32>
    %c0_2 = arith.constant 0 : index
    %c0_3 = arith.constant 0 : index
    %4 = vector.load %arg2[%c0_2, %c0_3] : memref<2x256xf32, #tpu.memory_space<vmem>>, vector<2x256xf32>
    %5 = arith.truncf %4 : vector<2x256xf32> to vector<2x256xbf16>
    %c0_4 = arith.constant 0 : index
    %c0_5 = arith.constant 0 : index
    %6 = vector.load %arg3[%c0_4, %c0_5] : memref<256x64xbf16, #tpu.memory_space<vmem>>, vector<256x64xbf16>
    %cst = arith.constant dense<0.000000e+00> : vector<2x64xf32>
    %7 = tpu.matmul %5, %6, %cst {dimension_numbers = #tpu.dot_dimension_numbers<[1], [0], [0], [1], [0, 0, 1, 1], [], []>} : vector<2x256xbf16>, vector<256x64xbf16>, vector<2x64xf32> -> vector<2x64xf32>
    %8 = arith.addf %3, %7 : vector<2x64xf32>
    %c0_6 = arith.constant 0 : index
    %c0_7 = arith.constant 0 : index
    %9 = vector.load %arg8[%c0_6, %c0_7] : memref<2x64xf32, #tpu.memory_space<vmem>>, vector<2x64xf32>
    tpu.vector_store %arg8[%c0_6, %c0_7], %8 {strides = array<i32>} : memref<2x64xf32, #tpu.memory_space<vmem>>, vector<2x64xf32>,
    %c0_i32_8 = arith.constant 0 : i32
    %10 = arith.cmpi eq, %arg1, %c0_i32_8 : i32
    %11 = arith.extui %10 : i1 to i32
    %c0_i32_9 = arith.constant 0 : i32
    %12 = arith.cmpi ne, %11, %c0_i32_9 : i32
    scf.if %12 {
      %c0_10 = arith.constant 0 : index
      %c0_11 = arith.constant 0 : index
      %13 = vector.load %arg8[%c0_10, %c0_11] : memref<2x64xf32, #tpu.memory_space<vmem>>, vector<2x64xf32>
      %c0_12 = arith.constant 0 : index
      %c0_13 = arith.constant 0 : index
      %14 = vector.load %arg4[%c0_12, %c0_13] : memref<1x64xf32, #tpu.memory_space<vmem>>, vector<1x64xf32>
      %15 = vector.broadcast %14 : vector<1x64xf32> to vector<2x64xf32>
      %16 = arith.addf %13, %15 : vector<2x64xf32>
      %cst_14 = arith.constant 0.000000e+00 : f32
      %17 = vector.broadcast %cst_14 : f32 to vector<2x64xf32>
      %18 = arith.maximumf %16, %17 : vector<2x64xf32>
      %19 = arith.truncf %18 : vector<2x64xf32> to vector<2x64xbf16>
      %c0_15 = arith.constant 0 : index
      %c0_16 = arith.constant 0 : index
      %20 = vector.load %arg5[%c0_15, %c0_16] : memref<64x128xbf16, #tpu.memory_space<vmem>>, vector<64x128xbf16>
      %cst_17 = arith.constant dense<0.000000e+00> : vector<2x128xf32>
      %21 = tpu.matmul %19, %20, %cst_17 {dimension_numbers = #tpu.dot_dimension_numbers<[1], [0], [0], [1], [0, 0, 1, 1], [], []>} : vector<2x64xbf16>, vector<64x128xbf16>, vector<2x128xf32> -> vector<2x128xf32>
      %c0_18 = arith.constant 0 : index
      %c0_19 = arith.constant 0 : index
      %22 = vector.load %arg6[%c0_18, %c0_19] : memref<1x128xf32, #tpu.memory_space<vmem>>, vector<1x128xf32>
      %23 = vector.broadcast %22 : vector<1x128xf32> to vector<2x128xf32>
      %24 = arith.addf %21, %23 : vector<2x128xf32>
      %25 = arith.truncf %24 : vector<2x128xf32> to vector<2x128xbf16>
      %c0_20 = arith.constant 0 : index
      %c0_21 = arith.constant 0 : index
      %26 = vector.load %arg7[%c0_20, %c0_21] : memref<2x128xbf16, #tpu.memory_space<vmem>>, vector<2x128xbf16>
      tpu.vector_store %arg7[%c0_20, %c0_21], %25 {strides = array<i32>} : memref<2x128xbf16, #tpu.memory_space<vmem>>, vector<2x128xbf16>,
    } else {
    }
    return
  }
  func.func @transform_0(%arg0: i32, %arg1: i32) -> (i32, i32) {
    %c0_i32 = arith.constant 0 : i32
    return %arg0, %arg1 : i32, i32
  }
  func.func @transform_1(%arg0: i32, %arg1: i32) -> (i32, i32) {
    %c0_i32 = arith.constant 0 : i32
    %c0_i32_0 = arith.constant 0 : i32
    return %arg1, %c0_i32 : i32, i32
  }
  func.func @transform_2(%arg0: i32, %arg1: i32) -> (i32, i32) {
    %c0_i32 = arith.constant 0 : i32
    %c0_i32_0 = arith.constant 0 : i32
    %c0_i32_1 = arith.constant 0 : i32
    return %c0_i32, %c0_i32_0 : i32, i32
  }
  func.func @transform_3(%arg0: i32, %arg1: i32) -> (i32, i32) {
    %c0_i32 = arith.constant 0 : i32
    %c0_i32_0 = arith.constant 0 : i32
    %c0_i32_1 = arith.constant 0 : i32
    return %c0_i32, %c0_i32_0 : i32, i32
  }
  func.func @transform_4(%arg0: i32, %arg1: i32) -> (i32, i32) {
    %c0_i32 = arith.constant 0 : i32
    %c0_i32_0 = arith.constant 0 : i32
    %c0_i32_1 = arith.constant 0 : i32
    return %c0_i32, %c0_i32_0 : i32, i32
  }
  func.func @transform_5(%arg0: i32, %arg1: i32) -> (i32, i32) {
    %c0_i32 = arith.constant 0 : i32
    %c0_i32_0 = arith.constant 0 : i32
    return %arg0, %c0_i32 : i32, i32
  }
}

</mosaic_0001>

<bundles_post_ra>
// kernel: speakernet_forward.1
= control target key start
LH: loop header
LB: loop body
LE: loop exit
PB: predicated region body
PF: predicated region fallthrough
CT: control target
= control target key end

     0   :  { %s514_s0 = inlined_call_operand.vmem [shape: f32[2,256], index: 0, kind: input, shape index: {}]   ;;  %s515_s1 = inlined_call_operand.vmem [shape: bf16[256,64], index: 1, kind: input, shape index: {}]   ;;  %s516_s2 = inlined_call_operand.vmem [shape: f32[1,64], index: 2, kind: input, shape index: {}]   ;;  %s517_s3 = inlined_call_operand.vmem [shape: bf16[64,128], index: 3, kind: input, shape index: {}]   ;;  %s518_s4 = inlined_call_operand.vmem [shape: f32[1,128], index: 4, kind: input, shape index: {}]   ;;  %s519_s5 = inlined_call_operand.hbm [shape: bf16[2,128], index: 5, kind: output, shape index: {}]  }
   0x1   :  { %v365_v0 = vld [vmem:[%s515_s1 + $0x38] sm:$0xff]  ;;  %v364_v2 = vld [vmem:[%s515_s1 + $0x30] sm:$0xff]  ;;  %v363_v4 = vld [vmem:[%s515_s1 + $0x28] sm:$0xff] }
   0x2   :  { %v373_v1 = vld [vmem:[%s515_s1 + $0x78] sm:$0xff]  ;;  %166 = vmatpush.bf16.msra.mxu0 %v365_v0  ;;  %v372_v3 = vld [vmem:[%s515_s1 + $0x70] sm:$0xff]  ;;  %v371_v5 = vld [vmem:[%s515_s1 + $0x68] sm:$0xff] }
   0x3   :  { %179 = vmatpush.bf16.msra.mxu1 %v373_v1  ;;  %v29_v6 = vld [vmem:[%s514_s0] sm:$0xf] }
   0x4   :  { %31 = vst [vmem:[#allocation1] ss:$4 sm:$0xff] %v29_v6 }
   0x6   :  { %167 = vmatpush.bf16.msra.mxu0 %v364_v2 }
   0x7   :  { %180 = vmatpush.bf16.msra.mxu1 %v372_v3 }
   0x8   :  { %10 = vsyncpa [#allocation4], 0  ;;  %v362_v7 = vld [vmem:[%s515_s1 + $0x20] sm:$0xff]  ;;  %v361_v9 = vld [vmem:[%s515_s1 + $0x18] sm:$0xff]  ;;  %vm26_vm0 = vcmask 517120   ;;  %v408_v21 = vmov 0.0  }
   0x9   :  { %v370_v8 = vld [vmem:[%s515_s1 + $0x60] sm:$0xff]  ;;  %v369_v10 = vld [vmem:[%s515_s1 + $0x58] sm:$0xff]  ;;  %v360_v11 = vld [vmem:[%s515_s1 + $0x10] sm:$0xff]  ;;  %27 = vst.msk [vmem:[#allocation2] sm:$0x3] %vm26_vm0, %v408_v21  ;;  %vm242_vm1 = vcmask 523264  }
   0xa   :  { %168 = vmatpush.bf16.msra.mxu0 %v363_v4  ;;  %v368_v12 = vld [vmem:[%s515_s1 + $0x50] sm:$0xff]  ;;  %v359_v13 = vld [vmem:[%s515_s1 + $0x8] sm:$0xff]  ;;  %v358_v15 = vld [vmem:[%s515_s1] sm:$0xff]  ;;  %s409_s11 = smov [#allocation3]   ;;  %s268_s14 = sshll.u32 %s519_s5, 4  ;;  %s269_s14 = int_to_ptr.hbm [resolvable:$true] %s268_s14 }
   0xb   :  { %181 = vmatpush.bf16.msra.mxu1 %v371_v5  ;;  %v367_v14 = vld [vmem:[%s515_s1 + $0x48] sm:$0xff]  ;;  %v366_v16 = vld [vmem:[%s515_s1 + $0x40] sm:$0xff]  ;;  %v377_v22 = vld [vmem:[%s517_s3 + $0x18] sm:$0xff]  ;;  %s266_s12 = sshll.u32 %s409_s11, 4  ;;  %s267_s12 = int_to_ptr.vmem [resolvable:$true] %s266_s12 }
   0xc   :  { %v32_v17 = vld.sshfl [vmem:[#allocation1] sm:$0xff pattern:$0x73625140]  ;;  %v33_v18 = vld.sshfl [vmem:[#allocation1 + $0x8] sm:$0xff pattern:$0x73625140]  ;;  %250 = vmatpush.bf16.msra.mxu2 %v377_v22 }
   0xd   :  { %v36_v19 = vpack.c.bf16 %v32_v17, %v32_v17  ;;  %v37_v20 = vpack.c.bf16 %v33_v18, %v33_v18  ;;  %v376_v23 = vld [vmem:[%s517_s3 + $0x10] sm:$0xff]  ;;  %v375_v24 = vld [vmem:[%s517_s3 + $0x8] sm:$0xff]  ;;  %v374_v25 = vld [vmem:[%s517_s3] sm:$0xff] }
   0xe   :  { %169 = vmatpush.bf16.msra.mxu0 %v362_v7  ;;  %v380_v33 = vld [vmem:[%s516_s2] ss:$0 sm:$0xff] }
   0xf   :  { %182 = vmatpush.bf16.msra.mxu1 %v370_v8  ;;  %v381_v38 = vld [vmem:[%s518_s4] ss:$0 sm:$0xff] }
  0x10   :  { %251 = vmatpush.bf16.msra.mxu2 %v376_v23  ;;  %v28_v27 = vld [vmem:[#allocation2] sm:$0x3] }
  0x12   :  { %170 = vmatpush.bf16.msra.mxu0 %v361_v9 }
  0x13   :  { %183 = vmatpush.bf16.msra.mxu1 %v369_v10 }
  0x14   :  { %252 = vmatpush.bf16.msra.mxu2 %v375_v24 }
  0x16   :  { %171 = vmatpush.bf16.msra.mxu0 %v360_v11 }
  0x17   :  { %184 = vmatpush.bf16.msra.mxu1 %v368_v12 }
  0x18   :  { %253 = vmatpush.bf16.msra.mxu2 %v374_v25 }
  0x1a   :  { %172 = vmatpush.bf16.msra.mxu0 %v359_v13 }
  0x1b   :  { %185 = vmatpush.bf16.msra.mxu1 %v367_v14 }
  0x1e   :  { %173 = vmatpush.bf16.msra.mxu0 %v358_v15 }
  0x1f   :  { %186 = vmatpush.bf16.msra.mxu1 %v366_v16 }
  0x21   :  { %174 = vmatmul.bf16.vlgmr.msra.gmra.mxu0 %v36_v19 }
  0x22   :  { %187 = vmatmul.bf16.vlgmr.msra.gmra.mxu1 %v37_v20 }
  0x9e   :  { %v175_v26 = vpop.f32.mrf.mxu0 }
  0x9f   :  { %v188_v28 = vpop.f32.mrf.mxu1 }
  0xa0   :  { %v189_v29 = vadd.f32 %v188_v28, %v175_v26 }
  0xa2   :  { %v192_v30 = vadd.f32 %v189_v29, %v28_v27 }
  0xa4   :  { %194 = vst.msk [vmem:[#allocation2] sm:$0x3] %vm26_vm0, %v192_v30 }
  0xa6   :  { %v177_v31 = vpop.f32.mrf.mxu0 }
  0xa7   :  { %v190_v32 = vpop.f32.mrf.mxu1 }
  0xab   :  { %v198_v34 = vld [vmem:[#allocation2] sm:$0x3] }
  0xac   :  { %v203_v35 = vadd.f32 %v380_v33, %v198_v34 }
  0xae   :  { %v204_v36 = vmax.f32 %v203_v35, 0.0 }
  0xb0   :  { %v205_v37 = vpack.c.bf16 %v204_v36, %v204_v36 }
  0xb2   :  { %357 = vmatmul.msk.bf16.vlgmr.msra.gmra.mxu2 %vm242_vm1, %v205_v37 }
 0x135   :  { %v255_v39 = vpop.f32.mrf.mxu2 }
 0x136   :  { %v256_v40 = vadd.f32 %v381_v38, %v255_v39 }
 0x138   :  { %v259_v41 = vpack.c.bf16 %v256_v40, %v256_v40 }
 0x13a   :  { %260 = vst [vmem:[#allocation3] sm:$0x1] %v259_v41 }
 0x13b   :  { %271 = dma.vmem_to_hbm [thread:$0]  %s267_s12, 16, %s269_s14, [#allocation4]  }
 0x13d   :  { %v257_v42 = vpop.f32.mrf.mxu2 }
 0x13e   :  { %406 = dma.done.wait [#allocation4], 16  }
 0x13f   :  { %407 = vsyncadd [#allocation4], 4294967280 }
 0x140   :  { %276 = vsyncpa [#allocation4], 1 }

</bundles_post_ra>
